<compile_context>
chip_gen: v7x
topology: tpu7x:2x2x1
jax: 0.10.0
libtpu: 0.0.40
codegen_flags: <defaults>
</compile_context>

<pallas_src>
import jax
import jax.numpy as jnp
import numpy as np
from jax.experimental import pallas as pl
from jax.experimental.pallas import tpu as pltpu


def _make_ffconv_kernel(n_batch, wp, q, ksize, downsample):
    """Builds the kernel body; static shape params are closed over (trace-time constants)."""
    kh, kw = ksize
    offs = [r * wp + c for r in range(kh) for c in range(kw)]

    def conv_one_sample(x_ref, w, n):
        # 9 shifted views of the flattened padded image (each (Cpad, Q)) stacked along the
        # contraction axis -> ONE MXU matmul with K = kh*kw*Cpad.
        parts = [x_ref[n, :, pl.ds(off, q)].astype(jnp.float32) for off in offs]
        pmat = jnp.concatenate(parts, axis=0)                          # (kh*kw*Cpad, Q)
        return jnp.dot(w, pmat, preferred_element_type=jnp.float32)    # (Cout, Q)

    if downsample:
        def kernel(x_ref, w_ref, sel_ref, o_ref):
            w = w_ref[...]
            sel = sel_ref[...]
            for n in range(n_batch):
                y = conv_one_sample(x_ref, w, n)                       # (Cout, Q)
                # 2x2 max-pool: vertical neighbours are WP lanes apart, horizontal adjacent.
                vert = jnp.maximum(y[:, : q - wp], y[:, wp:])          # (Cout, Q-WP)
                horz = jnp.maximum(vert[:, : q - wp - 1], vert[:, 1:])  # (Cout, Q-WP-1)
                # 0/1 selection matmul compacts the stride-2 anchors -> (Cout, Hh*Wh).
                o_ref[n] = jnp.dot(horz, sel, preferred_element_type=jnp.float32)
        return kernel

    def kernel(x_ref, w_ref, o_ref):
        w = w_ref[...]
        for n in range(n_batch):
            o_ref[n] = conv_one_sample(x_ref, w, n)
    return kernel


def ffconv2d_forward(x, weight, *, downsample=False):
    """Matches FFconv2d.forward: Conv2d(3x3, stride 1, pad 1, no bias) [+ MaxPool2d(2,2)]."""
    N, Cin, H, W = x.shape
    Cout, Cin_w, KH, KW = weight.shape
    assert Cin_w == Cin and (KH, KW) == (3, 3) and H % 2 == 0 and W % 2 == 0
    pad = 1
    HP, WP = H + 2 * pad, W + 2 * pad
    Q = H * WP                # conv evaluated on an (H, WP) column grid; last 2 cols are junk
    CPAD = 8                  # pad channels to a full f32 sublane tile (aligned loads)
    KBIG = KH * KW * CPAD     # MXU contraction dim (zero rows for the padded channels)

    # Flattened, spatially padded, channel-padded input -> (N, CPAD, L) bf16 in HBM.
    need = (KH - 1) * WP + (KW - 1) + Q
    L = ((need + 127) // 128) * 128
    xp = jnp.pad(x, ((0, 0), (0, 0), (pad, pad), (pad, pad)))
    xp = jnp.pad(xp, ((0, 0), (0, CPAD - Cin), (0, 0), (0, 0)))
    xf = xp.reshape(N, CPAD, HP * WP)
    xf = jnp.pad(xf, ((0, 0), (0, 0), (0, L - HP * WP))).astype(jnp.bfloat16)

    # Weights flattened as (Cout, (kh, kw, padded-ci)) to match the kernel's patch row order.
    wt = jnp.transpose(weight, (0, 2, 3, 1))                            # (Cout, KH, KW, Cin)
    wt = jnp.pad(wt, ((0, 0), (0, 0), (0, 0), (0, CPAD - Cin)))
    w_mat = wt.reshape(Cout, KBIG).astype(jnp.float32)

    if not downsample:
        kernel = _make_ffconv_kernel(N, WP, Q, (KH, KW), downsample=False)
        out = pl.pallas_call(
            kernel,
            out_shape=jax.ShapeDtypeStruct((N, Cout, Q), jnp.float32),
            grid=(1,),
            in_specs=[
                pl.BlockSpec((N, CPAD, L), lambda i: (0, 0, 0)),
                pl.BlockSpec((Cout, KBIG), lambda i: (0, 0)),
            ],
            out_specs=pl.BlockSpec((N, Cout, Q), lambda i: (0, 0, 0)),
            compiler_params=pltpu.CompilerParams(
                dimension_semantics=("arbitrary",)),
        )(xf, w_mat)
        # (N, Cout, H*WP) -> NCHW via pure reshape + lane slice (no transpose).
        return out.reshape(N, Cout, H, WP)[:, :, :, :W]

    # downsample=True: fused 2x2, stride-2 max pool.
    Hh, Wh = H // 2, W // 2
    QH = Q - WP - 1
    sel_np = np.zeros((QH, Hh * Wh), np.float32)
    for r in range(Hh):
        for c in range(Wh):
            sel_np[2 * r * WP + 2 * c, r * Wh + c] = 1.0
    sel = jnp.asarray(sel_np)

    kernel = _make_ffconv_kernel(N, WP, Q, (KH, KW), downsample=True)
    out = pl.pallas_call(
        kernel,
        out_shape=jax.ShapeDtypeStruct((N, Cout, Hh * Wh), jnp.float32),
        grid=(1,),
        in_specs=[
            pl.BlockSpec((N, CPAD, L), lambda i: (0, 0, 0)),
            pl.BlockSpec((Cout, KBIG), lambda i: (0, 0)),
            pl.BlockSpec((QH, Hh * Wh), lambda i: (0, 0)),
        ],
        out_specs=pl.BlockSpec((N, Cout, Hh * Wh), lambda i: (0, 0, 0)),
        compiler_params=pltpu.CompilerParams(
            dimension_semantics=("arbitrary",)),
    )(xf, w_mat, sel)
    return out.reshape(N, Cout, Hh, Wh)


def ffconv2d_reference(x, weight, *, downsample=False):
    y = jax.lax.conv_general_dilated(
        x, weight, window_strides=(1, 1), padding=((1, 1), (1, 1)),
        dimension_numbers=("NCHW", "OIHW", "NCHW"))
    if downsample:
        n, c, h, w = y.shape
        y = y.reshape(n, c, h // 2, 2, w // 2, 2).max(axis=(3, 5))
    return y


if __name__ == "__main__":
    N, Cin, H, W = 2, 4, 16, 16
    Cout = 8

    key = jax.random.PRNGKey(0)
    kx, kw = jax.random.split(key)
    x = jax.random.normal(kx, (N, Cin, H, W), dtype=jnp.float32)
    weight = 0.05 * jax.random.normal(kw, (Cout, Cin, 3, 3), dtype=jnp.float32)

    # bf16 input stream => tolerance loosened per the perf-review note (accumulation stays f32).
    for ds in (False, True):
        out = jax.block_until_ready(ffconv2d_forward(x, weight, downsample=ds))
        ref = ffconv2d_reference(x, weight, downsample=ds)
        np.testing.assert_allclose(np.asarray(out), np.asarray(ref),
                                   rtol=1e-2, atol=2e-2)

    print("KERNEL_OK")
</pallas_src>

<mosaic_0001>
module attributes {stable_mosaic.version = 11 : i64} {
  func.func @kernel(%arg0: i32, %arg1: memref<2x8x384xbf16, #tpu.memory_space<vmem>>, %arg2: memref<8x72xf32, #tpu.memory_space<vmem>>, %arg3: memref<2x8x288xf32, #tpu.memory_space<vmem>>) attributes {dimension_semantics = [#tpu.dimension_semantics<arbitrary>], iteration_bounds = array<i64: 1>, scalar_prefetch = 0 : i64, scratch_operands = 0 : i64, tpu.core_type = #tpu.core_type<tc>, window_params = [{pipeline_mode = #tpu.pipeline_mode<synchronous>, transform_indices = @transform_0, window_bounds = array<i64: 2, 8, 384>}, {pipeline_mode = #tpu.pipeline_mode<synchronous>, transform_indices = @transform_1, window_bounds = array<i64: 8, 72>}, {pipeline_mode = #tpu.pipeline_mode<synchronous>, transform_indices = @transform_2, window_bounds = array<i64: 2, 8, 288>}]} {
    %c0 = arith.constant 0 : index
    %c0_0 = arith.constant 0 : index
    %0 = vector.load %arg2[%c0, %c0_0] : memref<8x72xf32, #tpu.memory_space<vmem>>, vector<8x72xf32>
    %c0_1 = arith.constant 0 : index
    %c0_2 = arith.constant 0 : index
    %c0_3 = arith.constant 0 : index
    %1 = vector.load %arg1[%c0_1, %c0_2, %c0_3] : memref<2x8x384xbf16, #tpu.memory_space<vmem>>, vector<1x8x288xbf16>
    %2 = vector.shape_cast %1 : vector<1x8x288xbf16> to vector<8x288xbf16>
    %3 = arith.extf %2 : vector<8x288xbf16> to vector<8x288xf32>
    %c0_4 = arith.constant 0 : index
    %c0_5 = arith.constant 0 : index
    %c1 = arith.constant 1 : index
    %4 = vector.load %arg1[%c0_4, %c0_5, %c1] : memref<2x8x384xbf16, #tpu.memory_space<vmem>>, vector<1x8x288xbf16>
    %5 = vector.shape_cast %4 : vector<1x8x288xbf16> to vector<8x288xbf16>
    %6 = arith.extf %5 : vector<8x288xbf16> to vector<8x288xf32>
    %c0_6 = arith.constant 0 : index
    %c0_7 = arith.constant 0 : index
    %c2 = arith.constant 2 : index
    %7 = vector.load %arg1[%c0_6, %c0_7, %c2] : memref<2x8x384xbf16, #tpu.memory_space<vmem>>, vector<1x8x288xbf16>
    %8 = vector.shape_cast %7 : vector<1x8x288xbf16> to vector<8x288xbf16>
    %9 = arith.extf %8 : vector<8x288xbf16> to vector<8x288xf32>
    %c0_8 = arith.constant 0 : index
    %c0_9 = arith.constant 0 : index
    %c18 = arith.constant 18 : index
    %10 = vector.load %arg1[%c0_8, %c0_9, %c18] : memref<2x8x384xbf16, #tpu.memory_space<vmem>>, vector<1x8x288xbf16>
    %11 = vector.shape_cast %10 : vector<1x8x288xbf16> to vector<8x288xbf16>
    %12 = arith.extf %11 : vector<8x288xbf16> to vector<8x288xf32>
    %c0_10 = arith.constant 0 : index
    %c0_11 = arith.constant 0 : index
    %c19 = arith.constant 19 : index
    %13 = vector.load %arg1[%c0_10, %c0_11, %c19] : memref<2x8x384xbf16, #tpu.memory_space<vmem>>, vector<1x8x288xbf16>
    %14 = vector.shape_cast %13 : vector<1x8x288xbf16> to vector<8x288xbf16>
    %15 = arith.extf %14 : vector<8x288xbf16> to vector<8x288xf32>
    %c0_12 = arith.constant 0 : index
    %c0_13 = arith.constant 0 : index
    %c20 = arith.constant 20 : index
    %16 = vector.load %arg1[%c0_12, %c0_13, %c20] : memref<2x8x384xbf16, #tpu.memory_space<vmem>>, vector<1x8x288xbf16>
    %17 = vector.shape_cast %16 : vector<1x8x288xbf16> to vector<8x288xbf16>
    %18 = arith.extf %17 : vector<8x288xbf16> to vector<8x288xf32>
    %c0_14 = arith.constant 0 : index
    %c0_15 = arith.constant 0 : index
    %c36 = arith.constant 36 : index
    %19 = vector.load %arg1[%c0_14, %c0_15, %c36] : memref<2x8x384xbf16, #tpu.memory_space<vmem>>, vector<1x8x288xbf16>
    %20 = vector.shape_cast %19 : vector<1x8x288xbf16> to vector<8x288xbf16>
    %21 = arith.extf %20 : vector<8x288xbf16> to vector<8x288xf32>
    %c0_16 = arith.constant 0 : index
    %c0_17 = arith.constant 0 : index
    %c37 = arith.constant 37 : index
    %22 = vector.load %arg1[%c0_16, %c0_17, %c37] : memref<2x8x384xbf16, #tpu.memory_space<vmem>>, vector<1x8x288xbf16>
    %23 = vector.shape_cast %22 : vector<1x8x288xbf16> to vector<8x288xbf16>
    %24 = arith.extf %23 : vector<8x288xbf16> to vector<8x288xf32>
    %c0_18 = arith.constant 0 : index
    %c0_19 = arith.constant 0 : index
    %c38 = arith.constant 38 : index
    %25 = vector.load %arg1[%c0_18, %c0_19, %c38] : memref<2x8x384xbf16, #tpu.memory_space<vmem>>, vector<1x8x288xbf16>
    %26 = vector.shape_cast %25 : vector<1x8x288xbf16> to vector<8x288xbf16>
    %27 = arith.extf %26 : vector<8x288xbf16> to vector<8x288xf32>
    %28 = tpu.concatenate %3, %6, %9, %12, %15, %18, %21, %24, %27 in 0 : vector<8x288xf32>, vector<8x288xf32>, vector<8x288xf32>, vector<8x288xf32>, vector<8x288xf32>, vector<8x288xf32>, vector<8x288xf32>, vector<8x288xf32>, vector<8x288xf32> -> vector<72x288xf32>
    %cst = arith.constant dense<0.000000e+00> : vector<8x288xf32>
    %29 = tpu.matmul %0, %28, %cst {dimension_numbers = #tpu.dot_dimension_numbers<[1], [0], [0], [1], [0, 0, 1, 1], [], []>} : vector<8x72xf32>, vector<72x288xf32>, vector<8x288xf32> -> vector<8x288xf32>
    %c0_20 = arith.constant 0 : index
    %c0_21 = arith.constant 0 : index
    %c0_22 = arith.constant 0 : index
    %30 = vector.load %arg3[%c0_20, %c0_21, %c0_22] : memref<2x8x288xf32, #tpu.memory_space<vmem>>, vector<1x8x288xf32>
    %31 = vector.shape_cast %30 : vector<1x8x288xf32> to vector<8x288xf32>
    %32 = vector.shape_cast %29 : vector<8x288xf32> to vector<1x8x288xf32>
    tpu.vector_store %arg3[%c0_20, %c0_21, %c0_22], %32 {strides = array<i32>} : memref<2x8x288xf32, #tpu.memory_space<vmem>>, vector<1x8x288xf32>,
    %c1_23 = arith.constant 1 : index
    %c0_24 = arith.constant 0 : index
    %c0_25 = arith.constant 0 : index
    %33 = vector.load %arg1[%c1_23, %c0_24, %c0_25] : memref<2x8x384xbf16, #tpu.memory_space<vmem>>, vector<1x8x288xbf16>
    %34 = vector.shape_cast %33 : vector<1x8x288xbf16> to vector<8x288xbf16>
    %35 = arith.extf %34 : vector<8x288xbf16> to vector<8x288xf32>
    %c1_26 = arith.constant 1 : index
    %c0_27 = arith.constant 0 : index
    %c1_28 = arith.constant 1 : index
    %36 = vector.load %arg1[%c1_26, %c0_27, %c1_28] : memref<2x8x384xbf16, #tpu.memory_space<vmem>>, vector<1x8x288xbf16>
    %37 = vector.shape_cast %36 : vector<1x8x288xbf16> to vector<8x288xbf16>
    %38 = arith.extf %37 : vector<8x288xbf16> to vector<8x288xf32>
    %c1_29 = arith.constant 1 : index
    %c0_30 = arith.constant 0 : index
    %c2_31 = arith.constant 2 : index
    %39 = vector.load %arg1[%c1_29, %c0_30, %c2_31] : memref<2x8x384xbf16, #tpu.memory_space<vmem>>, vector<1x8x288xbf16>
    %40 = vector.shape_cast %39 : vector<1x8x288xbf16> to vector<8x288xbf16>
    %41 = arith.extf %40 : vector<8x288xbf16> to vector<8x288xf32>
    %c1_32 = arith.constant 1 : index
    %c0_33 = arith.constant 0 : index
    %c18_34 = arith.constant 18 : index
    %42 = vector.load %arg1[%c1_32, %c0_33, %c18_34] : memref<2x8x384xbf16, #tpu.memory_space<vmem>>, vector<1x8x288xbf16>
    %43 = vector.shape_cast %42 : vector<1x8x288xbf16> to vector<8x288xbf16>
    %44 = arith.extf %43 : vector<8x288xbf16> to vector<8x288xf32>
    %c1_35 = arith.constant 1 : index
    %c0_36 = arith.constant 0 : index
    %c19_37 = arith.constant 19 : index
    %45 = vector.load %arg1[%c1_35, %c0_36, %c19_37] : memref<2x8x384xbf16, #tpu.memory_space<vmem>>, vector<1x8x288xbf16>
    %46 = vector.shape_cast %45 : vector<1x8x288xbf16> to vector<8x288xbf16>
    %47 = arith.extf %46 : vector<8x288xbf16> to vector<8x288xf32>
    %c1_38 = arith.constant 1 : index
    %c0_39 = arith.constant 0 : index
    %c20_40 = arith.constant 20 : index
    %48 = vector.load %arg1[%c1_38, %c0_39, %c20_40] : memref<2x8x384xbf16, #tpu.memory_space<vmem>>, vector<1x8x288xbf16>
    %49 = vector.shape_cast %48 : vector<1x8x288xbf16> to vector<8x288xbf16>
    %50 = arith.extf %49 : vector<8x288xbf16> to vector<8x288xf32>
    %c1_41 = arith.constant 1 : index
    %c0_42 = arith.constant 0 : index
    %c36_43 = arith.constant 36 : index
    %51 = vector.load %arg1[%c1_41, %c0_42, %c36_43] : memref<2x8x384xbf16, #tpu.memory_space<vmem>>, vector<1x8x288xbf16>
    %52 = vector.shape_cast %51 : vector<1x8x288xbf16> to vector<8x288xbf16>
    %53 = arith.extf %52 : vector<8x288xbf16> to vector<8x288xf32>
    %c1_44 = arith.constant 1 : index
    %c0_45 = arith.constant 0 : index
    %c37_46 = arith.constant 37 : index
    %54 = vector.load %arg1[%c1_44, %c0_45, %c37_46] : memref<2x8x384xbf16, #tpu.memory_space<vmem>>, vector<1x8x288xbf16>
    %55 = vector.shape_cast %54 : vector<1x8x288xbf16> to vector<8x288xbf16>
    %56 = arith.extf %55 : vector<8x288xbf16> to vector<8x288xf32>
    %c1_47 = arith.constant 1 : index
    %c0_48 = arith.constant 0 : index
    %c38_49 = arith.constant 38 : index
    %57 = vector.load %arg1[%c1_47, %c0_48, %c38_49] : memref<2x8x384xbf16, #tpu.memory_space<vmem>>, vector<1x8x288xbf16>
    %58 = vector.shape_cast %57 : vector<1x8x288xbf16> to vector<8x288xbf16>
    %59 = arith.extf %58 : vector<8x288xbf16> to vector<8x288xf32>
    %60 = tpu.concatenate %35, %38, %41, %44, %47, %50, %53, %56, %59 in 0 : vector<8x288xf32>, vector<8x288xf32>, vector<8x288xf32>, vector<8x288xf32>, vector<8x288xf32>, vector<8x288xf32>, vector<8x288xf32>, vector<8x288xf32>, vector<8x288xf32> -> vector<72x288xf32>
    %cst_50 = arith.constant dense<0.000000e+00> : vector<8x288xf32>
    %61 = tpu.matmul %0, %60, %cst_50 {dimension_numbers = #tpu.dot_dimension_numbers<[1], [0], [0], [1], [0, 0, 1, 1], [], []>} : vector<8x72xf32>, vector<72x288xf32>, vector<8x288xf32> -> vector<8x288xf32>
    %c1_51 = arith.constant 1 : index
    %c0_52 = arith.constant 0 : index
    %c0_53 = arith.constant 0 : index
    %62 = vector.load %arg3[%c1_51, %c0_52, %c0_53] : memref<2x8x288xf32, #tpu.memory_space<vmem>>, vector<1x8x288xf32>
    %63 = vector.shape_cast %62 : vector<1x8x288xf32> to vector<8x288xf32>
    %64 = vector.shape_cast %61 : vector<8x288xf32> to vector<1x8x288xf32>
    tpu.vector_store %arg3[%c1_51, %c0_52, %c0_53], %64 {strides = array<i32>} : memref<2x8x288xf32, #tpu.memory_space<vmem>>, vector<1x8x288xf32>,
    return
  }
  func.func @transform_0(%arg0: i32) -> (i32, i32, i32) {
    %c0_i32 = arith.constant 0 : i32
    %c0_i32_0 = arith.constant 0 : i32
    %c0_i32_1 = arith.constant 0 : i32
    %c0_i32_2 = arith.constant 0 : i32
    return %c0_i32, %c0_i32_0, %c0_i32_1 : i32, i32, i32
  }
  func.func @transform_1(%arg0: i32) -> (i32, i32) {
    %c0_i32 = arith.constant 0 : i32
    %c0_i32_0 = arith.constant 0 : i32
    %c0_i32_1 = arith.constant 0 : i32
    return %c0_i32, %c0_i32_0 : i32, i32
  }
  func.func @transform_2(%arg0: i32) -> (i32, i32, i32) {
    %c0_i32 = arith.constant 0 : i32
    %c0_i32_0 = arith.constant 0 : i32
    %c0_i32_1 = arith.constant 0 : i32
    %c0_i32_2 = arith.constant 0 : i32
    return %c0_i32, %c0_i32_0, %c0_i32_1 : i32, i32, i32
  }
}

</mosaic_0001>

<bundles_post_ra>
// kernel: tpu_custom_call.1
= control target key start
LH: loop header
LB: loop body
LE: loop exit
PB: predicated region body
PF: predicated region fallthrough
CT: control target
= control target key end

     0   :  { %7 = vsyncpa [#allocation3], 0  ;;  %s1043_s0 = inlined_call_operand.hbm [shape: bf16[2,8,384], index: 0, kind: input, shape index: {}]   ;;  %s1044_s1 = inlined_call_operand.hbm [shape: f32[8,72], index: 1, kind: input, shape index: {}]   ;;  %s1045_s2 = inlined_call_operand.hbm [shape: f32[2,8,288], index: 2, kind: output, shape index: {}]  }
   0x1   :  { %8 = vsyncpa [#allocation6], 0 }
   0x2   :  { %9 = vsyncpa [#allocation4], 0  ;;  %s864_s9 = smov [#allocation2]   ;;  %s792_s13 = scalar_lea.hbm %s1043_s0, 384 }
   0x3   :  { %s15_s10 = sshll.u32 %s864_s9, 4  ;;  %p793_p0 = scmp.ne.s32.totalorder %s1043_s0, %s792_s13  ;;  %s16_s10 = int_to_ptr.vmem [resolvable:$true] %s15_s10 }
   0x4   :  { %p796_p1 = scmp.lt.u32.totalorder %s792_s13, %s1043_s0 }
   0x6   :  { %p798_p2 = pnand %p796_p1, %p793_p0 }
   0x8   :  { %801 = shalt.err (!%p798_p2)
}
   0x9   :  { %s802_s18 = scalar_lea.vmem %s16_s10, 384  ;;  %p807_p4 = scmp.lt.s32.totalorder %s16_s10, %s16_s10 }
   0xa   :  { %p803_p3 = scmp.ne.s32.totalorder %s16_s10, %s802_s18  ;;  %p808_p5 = scmp.lt.s32.totalorder %s802_s18, %s802_s18 }
   0xc   :  { %p809_p6 = por %p808_p5, %p807_p4 }
   0xe   :  { %p810_p7 = pnand %p809_p6, %p803_p3 }
  0x10   :  { %813 = shalt.err (!%p810_p7)
}
  0x11   :  { %s865_s19 = smov 192   ;;  %s866_s20 = smov 12  }
  0x12   :  { %21 = dma.hbm_to_vmem [thread:$0]  %s1043_s0, 384, %s16_s10, [#allocation3], %s865_s19, %s865_s19, %s866_s20  }
  0x13   :  { %s867_s23 = smov [#allocation5]   ;;  %s814_s27 = scalar_lea.hbm %s1044_s1, 128 }
  0x14   :  { %s28_s24 = sshll.u32 %s867_s23, 4  ;;  %p815_p8 = scmp.ne.s32.totalorder %s1044_s1, %s814_s27  ;;  %s29_s24 = int_to_ptr.vmem [resolvable:$true] %s28_s24 }
  0x15   :  { %p818_p9 = scmp.lt.u32.totalorder %s814_s27, %s1044_s1 }
  0x17   :  { %p820_p10 = pnand %p818_p9, %p815_p8 }
  0x19   :  { %823 = shalt.err (!%p820_p10)
}
  0x1a   :  { %s824_s4 = scalar_lea.vmem %s29_s24, 128  ;;  %p829_p12 = scmp.lt.s32.totalorder %s29_s24, %s29_s24 }
  0x1b   :  { %p825_p11 = scmp.ne.s32.totalorder %s29_s24, %s824_s4  ;;  %p830_p13 = scmp.lt.s32.totalorder %s824_s4, %s824_s4 }
  0x1d   :  { %p831_p0 = por %p830_p13, %p829_p12 }
  0x1f   :  { %p832_p1 = pnand %p831_p0, %p825_p11 }
  0x21   :  { %835 = shalt.err (!%p832_p1)
}
  0x22   :  { %31 = dma.hbm_to_vmem [thread:$0]  %s1044_s1, 128, %s29_s24, [#allocation6]  }
  0x23   :  { %858 = dma.done.wait [#allocation3], 384  }
  0x24   :  { %859 = vsyncadd [#allocation3], 4294966912 }
  0x25   :  { %860 = dma.done.wait [#allocation6], 128  }
  0x26   :  { %861 = vsyncadd [#allocation6], 4294967168  ;;  %v868_v0 = vmov 0.0|0.0   ;;  %v922_v1 = vld [vmem:[#allocation2] sm:$0xff]  ;;  %v40_v2 = vld [vmem:[#allocation2 + $0x8] ss:$12 sps:$4 sm:$0xff]  }
  0x27   :  { %634 = vmatprep.subr.bf16.mxu1 %v868_v0  ;;  %v293_v3 = vld [vmem:[#allocation2 + $0xc] sm:$0xff]  ;;  %v42_v4 = vunpack.c.h.bf16 %v922_v1  ;;  %v43_v5 = vunpack.c.l.bf16 %v40_v2  ;;  %v926_v6 = vunpack.c.l.bf16 %v922_v1  ;;  %s869_s1 = smov 126   ;;  %s870_s6 = smov 127   ;;  %v874_v10 = vmov 0.0  }
  0x28   :  { %v928_v7 = vunpack.c.h.bf16 %v293_v3  ;;  %s871_s7 = smov 110   ;;  %s872_s8 = smov 108   ;;  %211 = vmatprep.mubr.f32.mxu0 %v874_v10  ;;  %vm875_vm0 = vmmov 0   ;;  %v940_v11 = vunpack.c.l.bf16 %v293_v3  ;;  %v942_v12 = vunpack.c.h.bf16 %v40_v2 }
  0x29   :  { %v702_v8 = vpack.i.bf16 %v43_v5, %v42_v4  ;;  %s873_s9 = smov 109   ;;  %594 = vmatprep.mubr.msk.f32.mxu1 %vm875_vm0, %v874_v10  ;;  %s876_s10 = smov 91   ;;  %vm53_vm1 = vcmask 1039360   ;;  %vm65_vm2 = vcmask 1031168   ;;  %vm77_vm3 = vcmask 900096  }
  0x2a   :  { %v697_v9 = vpack.i.bf16 %v928_v7, %v926_v6  ;;  %s877_s11 = smov 92   ;;  %v752_v13 = vpack.i.bf16 %v940_v11, %v942_v12  ;;  %s878_s12 = smov 90   ;;  %v772_v14 = vpack.i.bf16 %v942_v12, %v928_v7  ;;  %vm101_vm4 = vcmask 883712  }
  0x2b   :  { %703 = vrot.lane.b32.xlu1 %v702_v8, %s869_s1  ;;  %693 = vrot.lane.b32.xlu0 %v702_v8, %s870_s6  ;;  %vm89_vm5 = vcmask 891904   ;;  %vm125_vm6 = vcmask 744448   ;;  %vm113_vm7 = vcmask 752640   ;;  %vm137_vm8 = vcmask 736256   ;;  %s879_s13 = smov [#allocation7]  }
  0x2c   :  { %vm143_vm9 = vcmask 588800   ;;  %vm290_vm10 = vcmask 261120   ;;  %s539_s14 = sshll.u32 %s879_s13, 4  ;;  %s540_s14 = int_to_ptr.vmem [resolvable:$true] %s539_s14 }
  0x2d   :  { %s836_s15 = scalar_lea.vmem %s540_s14, 768  ;;  %p841_p3 = scmp.lt.s32.totalorder %s540_s14, %s540_s14 }
  0x2e   :  { %p837_p2 = scmp.ne.s32.totalorder %s540_s14, %s836_s15  ;;  %p842_p4 = scmp.lt.s32.totalorder %s836_s15, %s836_s15 }
  0x2f   :  { %708 = vrot.lane.b32.xlu1 %v702_v8, %s871_s7  ;;  %698 = vrot.lane.b32.xlu0 %v697_v9, %s870_s6 }
  0x30   :  { %p843_p5 = por %p842_p4, %p841_p3 }
  0x32   :  { %p844_p6 = pnand %p843_p5, %p837_p2 }
  0x33   :  { %718 = vrot.lane.b32.xlu1 %v697_v9, %s871_s7  ;;  %713 = vrot.lane.b32.xlu0 %v697_v9, %s869_s1 }
  0x37   :  { %728 = vrot.lane.b32.xlu1 %v702_v8, %s872_s8  ;;  %723 = vrot.lane.b32.xlu0 %v702_v8, %s873_s9 }
  0x3b   :  { %95 = vrot.lane.b32.xlu1 %v926_v6, %s872_s8  ;;  %733 = vrot.lane.b32.xlu0 %v697_v9, %s873_s9 }
  0x3f   :  { %743 = vrot.lane.b32.xlu1 %v702_v8, %s876_s10  ;;  %738 = vrot.lane.b32.xlu0 %v702_v8, %s877_s11 }
  0x43   :  { %119 = vrot.lane.b32.xlu1 %v926_v6, %s876_s10  ;;  %107 = vrot.lane.b32.xlu0 %v926_v6, %s877_s11 }
  0x47   :  { %753 = vrot.lane.b32.xlu1 %v752_v13, %s870_s6  ;;  %748 = vrot.lane.b32.xlu0 %v702_v8, %s878_s12 }
  0x4b   :  { %758 = vrot.lane.b32.xlu1 %v752_v13, %s869_s1  ;;  %131 = vrot.lane.b32.xlu0 %v926_v6, %s878_s12 }
  0x4f   :  { %768 = vrot.lane.b32.xlu1 %v752_v13, %s873_s9  ;;  %763 = vrot.lane.b32.xlu0 %v752_v13, %s871_s7 }
  0x53   :  { %345 = vrot.lane.b32.xlu1 %v940_v11, %s872_s8  ;;  %773 = vrot.lane.b32.xlu0 %v772_v14, %s872_s8 }
  0x57   :  { %783 = vrot.lane.b32.xlu1 %v772_v14, %s876_s10  ;;  %778 = vrot.lane.b32.xlu0 %v772_v14, %s877_s11 }
  0x5b   :  { %367 = vrot.lane.b32.xlu1 %v940_v11, %s876_s10  ;;  %356 = vrot.lane.b32.xlu0 %v940_v11, %s877_s11 }
  0x5f   :  { %788 = vrot.lane.b32.xlu0 %v772_v14, %s878_s12  ;;  %378 = vrot.lane.b32.xlu1 %v940_v11, %s878_s12 }
  0x9d   :  { %v704_v15 = vpop.permute.xlu1 %703  ;;  %v694_v16 = vpop.permute.xlu0 %693 }
  0x9e   :  { %v696_v17 = vunpack.i.h.bf16 %v694_v16  ;;  %v695_v18 = vunpack.i.l.bf16 %v694_v16  ;;  %v706_v19 = vunpack.i.h.bf16 %v704_v15  ;;  %v705_v20 = vunpack.i.l.bf16 %v704_v15 }
  0xa0   :  { %v635_v21 = vpack.c.bf16 %v696_v17, %v43_v5  ;;  %v55_v22 = vsel %vm53_vm1, %v695_v18, %v696_v17  ;;  %v67_v31 = vsel %vm65_vm2, %v705_v20, %v706_v19 }
  0xa1   :  { %v709_v23 = vpop.permute.xlu1 %708  ;;  %v958_v24 = vpop.permute.xlu0 %698  ;;  %v618_v25 = vpack.c.bf16 %v55_v22, %v42_v4 }
  0xa2   :  { %v711_v26 = vunpack.i.h.bf16 %v709_v23  ;;  %v710_v27 = vunpack.i.l.bf16 %v709_v23  ;;  %v700_v28 = vunpack.i.l.bf16 %v958_v24  ;;  %636 = vmatpush3.bf16.msra.mxu1 %v635_v21  ;;  %v701_v14 = vunpack.i.h.bf16 %v958_v24  ;;  %v989_v21 = vld [vmem:[#allocation5] sm:$0xff] }
  0xa3   :  { %619 = vmatprep.subr.bf16.mxu0 %v618_v25  ;;  %637 = vmatprep.subr.bf16.mxu1 %v868_v0 }
  0xa4   :  { %v638_v29 = vpack.c.bf16 %v711_v26, %v706_v19  ;;  %v54_v30 = vsel %vm53_vm1, %v700_v28, %v695_v18  ;;  %v79_v32 = vsel %vm77_vm3, %v710_v27, %v711_v26 }
  0xa5   :  { %v965_v33 = vpop.permute.xlu1 %718  ;;  %v967_v34 = vpop.permute.xlu0 %713  ;;  %v620_v35 = vpack.c.bf16 %v54_v30, %v926_v6  ;;  %v622_v36 = vpack.c.bf16 %v79_v32, %v67_v31 }
  0xa6   :  { %v720_v37 = vunpack.i.l.bf16 %v965_v33  ;;  %v715_v38 = vunpack.i.l.bf16 %v967_v34  ;;  %639 = vmatpush3.bf16.msra.mxu1 %v638_v29  ;;  %v716_v32 = vunpack.i.h.bf16 %v967_v34 }
  0xa7   :  { %621 = vmatpush1.bf16.msra.mxu0 %v620_v35  ;;  %640 = vmatprep.subr.bf16.mxu1 %v868_v0 }
  0xa8   :  { %623 = vmatprep.subr.bf16.mxu0 %v622_v36  ;;  %v66_v39 = vsel %vm65_vm2, %v715_v38, %v705_v20  ;;  %v78_v40 = vsel %vm77_vm3, %v720_v37, %v710_v27 }
  0xa9   :  { %v729_v41 = vpop.permute.xlu1 %728  ;;  %v724_v42 = vpop.permute.xlu0 %723  ;;  %v624_v43 = vpack.c.bf16 %v78_v40, %v66_v39 }
  0xaa   :  { %v731_v44 = vunpack.i.h.bf16 %v729_v41  ;;  %v730_v45 = vunpack.i.l.bf16 %v729_v41  ;;  %v726_v46 = vunpack.i.h.bf16 %v724_v42  ;;  %v725_v47 = vunpack.i.l.bf16 %v724_v42 }
  0xab   :  { %625 = vmatpush1.bf16.msra.mxu0 %v624_v43 }
  0xac   :  { %v641_v48 = vpack.c.bf16 %v731_v44, %v726_v46  ;;  %v91_v49 = vsel %vm89_vm5, %v725_v47, %v726_v46  ;;  %v103_v50 = vsel %vm101_vm4, %v730_v45, %v731_v44 }
  0xad   :  { %v96_v51 = vpop.permute.xlu1 %95  ;;  %v977_v52 = vpop.permute.xlu0 %733  ;;  %v626_v53 = vpack.c.bf16 %v103_v50, %v91_v49 }
  0xae   :  { %v735_v54 = vunpack.i.l.bf16 %v977_v52  ;;  %642 = vmatpush3.bf16.msra.mxu1 %v641_v48  ;;  %v102_v55 = vsel %vm101_vm4, %v96_v51, %v730_v45 }
  0xaf   :  { %627 = vmatprep.subr.bf16.mxu0 %v626_v53  ;;  %643 = vmatprep.subr.bf16.mxu1 %v868_v0 }
  0xb0   :  { %v90_v56 = vsel %vm89_vm5, %v735_v54, %v725_v47 }
  0xb1   :  { %v744_v57 = vpop.permute.xlu1 %743  ;;  %v739_v58 = vpop.permute.xlu0 %738  ;;  %v628_v59 = vpack.c.bf16 %v102_v55, %v90_v56 }
  0xb2   :  { %v746_v60 = vunpack.i.h.bf16 %v744_v57  ;;  %v745_v61 = vunpack.i.l.bf16 %v744_v57  ;;  %v741_v62 = vunpack.i.h.bf16 %v739_v58  ;;  %v740_v63 = vunpack.i.l.bf16 %v739_v58 }
  0xb3   :  { %629 = vmatpush1.bf16.msra.mxu0 %v628_v59 }
  0xb4   :  { %v644_v1 = vpack.c.bf16 %v746_v60, %v741_v62  ;;  %v115_v2 = vsel %vm113_vm7, %v740_v63, %v741_v62  ;;  %v127_v3 = vsel %vm125_vm6, %v745_v61, %v746_v60 }
  0xb5   :  { %v120_v4 = vpop.permute.xlu1 %119  ;;  %v108_v5 = vpop.permute.xlu0 %107  ;;  %v630_v6 = vpack.c.bf16 %v127_v3, %v115_v2 }
  0xb6   :  { %v126_v8 = vsel %vm125_vm6, %v120_v4, %v745_v61  ;;  %v114_v9 = vsel %vm113_vm7, %v108_v5, %v740_v63  ;;  %645 = vmatpush3.bf16.msra.mxu1 %v644_v1 }
  0xb7   :  { %v632_v13 = vpack.c.bf16 %v126_v8, %v114_v9  ;;  %631 = vmatprep.subr.bf16.mxu0 %v630_v6  ;;  %592 = vmatprep.subr.mxu1 %v874_v10 }
  0xb9   :  { %v754_v15 = vpop.permute.xlu1 %753  ;;  %v749_v16 = vpop.permute.xlu0 %748  ;;  %633 = vmatpush1.bf16.msra.mxu0 %v632_v13 }
  0xba   :  { %v756_v17 = vunpack.i.h.bf16 %v754_v15  ;;  %v755_v18 = vunpack.i.l.bf16 %v754_v15  ;;  %v751_v19 = vunpack.i.h.bf16 %v749_v16  ;;  %v750_v20 = vunpack.i.l.bf16 %v749_v16 }
  0xbc   :  { %v307_v22 = vsel %vm53_vm1, %v756_v17, %v701_v14  ;;  %v663_v23 = vpack.c.bf16 %v755_v18, %v942_v12  ;;  %593 = vmatpush3.msra.mxu1 %v751_v19  ;;  %v139_v25 = vsel %vm137_vm8, %v750_v20, %v751_v19  ;;  %v308_v24 = vsel %vm53_vm1, %v701_v14, %v755_v18 }
  0xbd   :  { %v759_v26 = vpop.permute.xlu1 %758  ;;  %v132_v27 = vpop.permute.xlu0 %131  ;;  %163 = vmatprep.subr.mxu0 %v139_v25  ;;  %662 = vmatprep.subr.bf16.mxu1 %v868_v0  ;;  %v646_v28 = vpack.c.bf16 %v308_v24, %v928_v7  ;;  %v648_v30 = vpack.c.bf16 %v307_v22, %v940_v11  ;;  %v721_v7 = vunpack.i.h.bf16 %v965_v33  ;;  %v736_v33 = vunpack.i.h.bf16 %v977_v52 }
  0xbe   :  { %v138_v29 = vsel %vm137_vm8, %v132_v27, %v750_v20  ;;  %595 = vmatmul.mubr.msk.f32.vlgmr.msra.gmra.mrb[0].mxu1 %vm143_vm9, %v989_v21  ;;  %v761_v12 = vunpack.i.h.bf16 %v759_v26  ;;  %v760_v31 = vunpack.i.l.bf16 %v759_v26 }
  0xbf   :  { %164 = vmatpush1.msra.mxu0 %v138_v29  ;;  %664 = vmatpush3.bf16.msra.mxu1 %v663_v23 }
  0xc0   :  { %647 = vmatprep.subr.bf16.mxu0 %v646_v28  ;;  %552 = vmatmul.mubr.msk.f32.vlgmr.msra.gmra.mrb[0].mxu0 %vm143_vm9, %v989_v21  ;;  %v318_v11 = vsel %vm65_vm2, %v761_v12, %v716_v32  ;;  %v319_v40 = vsel %vm65_vm2, %v716_v32, %v760_v31 }
  0xc1   :  { %v769_v35 = vpop.permute.xlu1 %768  ;;  %v764_v36 = vpop.permute.xlu0 %763  ;;  %649 = vmatpush1.bf16.msra.mxu0 %v648_v30  ;;  %665 = vmatprep.subr.bf16.mxu1 %v868_v0 }
  0xc2   :  { %v766_v37 = vunpack.i.h.bf16 %v764_v36  ;;  %v765_v38 = vunpack.i.l.bf16 %v764_v36  ;;  %453 = vmatprep.mubr.f32.mxu0 %v874_v10  ;;  %615 = vmatprep.mubr.msk.f32.mxu1 %vm875_vm0, %v874_v10  ;;  %v771_v39 = vunpack.i.h.bf16 %v769_v35  ;;  %v770_v34 = vunpack.i.l.bf16 %v769_v35 }
  0xc4   :  { %v329_v41 = vsel %vm77_vm3, %v766_v37, %v721_v7  ;;  %v666_v42 = vpack.c.bf16 %v765_v38, %v760_v31  ;;  %v330_v43 = vsel %vm77_vm3, %v721_v7, %v765_v38  ;;  %v340_v50 = vsel %vm89_vm5, %v771_v39, %v736_v33 }
  0xc5   :  { %v652_v44 = vpack.c.bf16 %v329_v41, %v318_v11  ;;  %v346_v45 = vpop.permute.xlu1 %345  ;;  %v774_v46 = vpop.permute.xlu0 %773  ;;  %v650_v47 = vpack.c.bf16 %v330_v43, %v319_v40  ;;  %v341_v54 = vsel %vm89_vm5, %v736_v33, %v770_v34 }
  0xc6   :  { %v776_v48 = vunpack.i.h.bf16 %v774_v46  ;;  %v775_v49 = vunpack.i.l.bf16 %v774_v46  ;;  %667 = vmatpush3.bf16.msra.mxu1 %v666_v42 }
  0xc7   :  { %651 = vmatprep.subr.bf16.mxu0 %v650_v47  ;;  %668 = vmatprep.subr.bf16.mxu1 %v868_v0 }
  0xc8   :  { %v669_v51 = vpack.c.bf16 %v776_v48, %v770_v34  ;;  %v351_v53 = vsel %vm101_vm4, %v346_v45, %v775_v49  ;;  %653 = vmatpush1.bf16.msra.mxu0 %v652_v44  ;;  %v352_v52 = vsel %vm101_vm4, %v775_v49, %v776_v48 }
  0xc9   :  { %v656_v55 = vpack.c.bf16 %v351_v53, %v340_v50  ;;  %v784_v56 = vpop.permute.xlu1 %783  ;;  %v779_v57 = vpop.permute.xlu0 %778  ;;  %v654_v58 = vpack.c.bf16 %v352_v52, %v341_v54 }
  0xca   :  { %v786_v59 = vunpack.i.h.bf16 %v784_v56  ;;  %v785_v60 = vunpack.i.l.bf16 %v784_v56  ;;  %v781_v61 = vunpack.i.h.bf16 %v779_v57  ;;  %v780_v62 = vunpack.i.l.bf16 %v779_v57  ;;  %670 = vmatpush3.bf16.msra.mxu1 %v669_v51 }
  0xcb   :  { %655 = vmatprep.subr.bf16.mxu0 %v654_v58  ;;  %671 = vmatprep.subr.bf16.mxu1 %v868_v0 }
  0xcc   :  { %v672_v63 = vpack.c.bf16 %v786_v59, %v781_v61  ;;  %657 = vmatpush1.bf16.msra.mxu0 %v656_v55  ;;  %v363_v1 = vsel %vm113_vm7, %v780_v62, %v781_v61  ;;  %v374_v2 = vsel %vm125_vm6, %v785_v60, %v786_v59 }
  0xcd   :  { %v368_v3 = vpop.permute.xlu1 %367  ;;  %v357_v4 = vpop.permute.xlu0 %356  ;;  %v658_v5 = vpack.c.bf16 %v374_v2, %v363_v1 }
  0xce   :  { %v373_v6 = vsel %vm125_vm6, %v368_v3, %v785_v60  ;;  %v362_v8 = vsel %vm113_vm7, %v357_v4, %v780_v62  ;;  %673 = vmatpush3.bf16.msra.mxu1 %v672_v63 }
  0xcf   :  { %v660_v9 = vpack.c.bf16 %v373_v6, %v362_v8  ;;  %659 = vmatprep.subr.bf16.mxu0 %v658_v5  ;;  %613 = vmatprep.subr.mxu1 %v874_v10 }
  0xd1   :  { %v789_v13 = vpop.permute.xlu0 %788  ;;  %661 = vmatpush1.bf16.msra.mxu0 %v660_v9  ;;  %v379_v0 = vpop.permute.xlu1 %378 }
  0xd2   :  { %v791_v14 = vunpack.i.h.bf16 %v789_v13  ;;  %v790_v15 = vunpack.i.l.bf16 %v789_v13 }
  0xd4   :  { %v384_v16 = vsel %vm137_vm8, %v379_v0, %v790_v15  ;;  %614 = vmatpush3.msra.mxu1 %v791_v14  ;;  %v385_v17 = vsel %vm137_vm8, %v790_v15, %v791_v14 }
  0xd5   :  { %405 = vmatprep.subr.mxu0 %v385_v17  ;;  %616 = vmatmul.mubr.msk.f32.vlgmr.msra.gmra.mrb[2].mxu1 %vm143_vm9, %v989_v21 }
  0xd6   :  { %406 = vmatpush1.msra.mxu0 %v384_v16 }
  0xd7   :  { %554 = vmatmul.mubr.msk.f32.vlgmr.msra.gmra.mrb[2].mxu0 %vm143_vm9, %v989_v21 }
 0x191   :  { %v284_v10 = vpop.f32.mrb[0].mxu1 }
 0x192   :  { %291 = vst.msk [vmem:[#allocation7 + $0x10] sm:$0xff] %vm290_vm10, %v284_v10  ;;  %v596_v18 = vpop.f32.mrb[1].mxu1 }
 0x193   :  { %v213_v19 = vpop.f32.mrb[0].mxu0 }
 0x194   :  { %288 = vst [vmem:[#allocation7] sm:$0xff] %v213_v19  ;;  %v215_v20 = vpop.f32.mrb[1].mxu0 }
 0x195   :  { %289 = vst [vmem:[#allocation7 + $0x8] sm:$0xff] %v215_v20 }
 0x1a8   :  { %v526_v22 = vpop.f32.mrb[2].mxu1 }
 0x1a9   :  { %533 = vst.msk [vmem:[#allocation7 + $0x28] sm:$0xff] %vm290_vm10, %v526_v22  ;;  %v617_v23 = vpop.f32.mrb[3].mxu1 }
 0x1aa   :  { %v455_v25 = vpop.f32.mrb[2].mxu0 }
 0x1ab   :  { %531 = vst [vmem:[#allocation7 + $0x18] sm:$0xff] %v455_v25  ;;  %v457_v24 = vpop.f32.mrb[3].mxu0 }
 0x1ac   :  { %532 = vst [vmem:[#allocation7 + $0x20] sm:$0xff] %v457_v24 }
 0x1ad   :  { %847 = shalt.err (!%p844_p6)
}
 0x1ae   :  { %s848_s18 = scalar_lea.hbm %s1045_s2, 768 }
 0x1af   :  { %p849_p7 = scmp.ne.s32.totalorder %s1045_s2, %s848_s18  ;;  %p852_p8 = scmp.lt.u32.totalorder %s848_s18, %s1045_s2 }
 0x1b1   :  { %p854_p9 = pnand %p852_p8, %p849_p7 }
 0x1b3   :  { %857 = shalt.err (!%p854_p9)
}
 0x1b4   :  { %s880_s23 = smov 384   ;;  %s881_s24 = smov 24  }
 0x1b5   :  { %545 = dma.vmem_to_hbm [thread:$0]  %s540_s14, 768, %s1045_s2, [#allocation4], %s880_s23, %s880_s23, %s881_s24  }
 0x1b6   :  { %862 = dma.done.wait [#allocation4], 768  }
 0x1b7   :  { %863 = vsyncadd [#allocation4], 4294966528 }
 0x1b8   :  { %549 = vsyncpa [#allocation3], 1 }
 0x1b9   :  { %550 = vsyncpa [#allocation6], 1 }
 0x1ba   :  { %551 = vsyncpa [#allocation4], 1 }

</bundles_post_ra>
